<compile_context>
chip_gen: v7x
topology: tpu7x:2x2x1
jax: 0.10.0
libtpu: 0.0.40
codegen_flags: <defaults>
</compile_context>

<pallas_src>
import functools
import math

import jax
import jax.numpy as jnp
from jax import lax
from jax.experimental import pallas as pl
from jax.experimental.pallas import tpu as pltpu


# ----------------------------------------------------------------------------
# Helpers
# ----------------------------------------------------------------------------
def _pick_tile(dim, pref, multiple):
    """Largest tile <= pref that divides `dim`, preferring multiples of `multiple`.
    Falls back to the full dimension (always a legal BlockSpec block)."""
    if dim <= pref:
        return dim
    t = (pref // multiple) * multiple
    while t >= multiple:
        if dim % t == 0:
            return t
        t -= multiple
    return dim


def _vmem_limit(working_set_bytes):
    """Scoped-VMEM request sized from the block working set (>= 32 MiB default,
    capped at 64 MiB so it is valid on v7x as well as v5e/v6e)."""
    return int(min(64 * 2**20, max(32 * 2**20, int(working_set_bytes * 1.5) + (1 << 20))))


# ----------------------------------------------------------------------------
# Fused linear(s):  y_t = x @ W_t^T   (nn.Linear (out_features, in_features)
# layout, bias=False).  One pallas_call reads x once for all n_out weights.
# ----------------------------------------------------------------------------
def _matmul_resident_kernel(x_ref, *refs, n_out):
    # refs = (w_0..w_{n-1}, o_0..o_{n-1}); weights are full-K, VMEM-resident.
    x = x_ref[...]                                   # (tm, K)
    nt_dims = (((1,), (1,)), ((), ()))               # contract in_features
    for t in range(n_out):
        w_ref = refs[t]
        o_ref = refs[n_out + t]
        o_ref[...] = lax.dot_general(
            x, w_ref[...], nt_dims,
            preferred_element_type=jnp.float32).astype(o_ref.dtype)


def _matmul_ktiled_kernel(x_ref, *refs, n_out):
    # refs = (w_0.., o_0.., acc_0..); K is the (innermost, "arbitrary") grid axis.
    w_refs = refs[:n_out]
    o_refs = refs[n_out:2 * n_out]
    acc_refs = refs[2 * n_out:]
    kk = pl.program_id(1)

    @pl.when(kk == 0)
    def _():
        for a in acc_refs:
            a[...] = jnp.zeros_like(a)

    x = x_ref[...]
    nt_dims = (((1,), (1,)), ((), ()))
    for t in range(n_out):
        acc_refs[t][...] += lax.dot_general(
            x, w_refs[t][...], nt_dims, preferred_element_type=jnp.float32)

    @pl.when(kk == pl.num_programs(1) - 1)
    def _():
        for t in range(n_out):
            o_refs[t][...] = acc_refs[t][...].astype(o_refs[t].dtype)


def pallas_fused_linear(x2d, weights, *, out_dtype):
    """x2d: (M, K); weights: tuple of (N, K) matrices.  Returns tuple of (M, N)."""
    M, K = x2d.shape
    n_out = len(weights)
    N = weights[0].shape[0]
    itemsize = jnp.dtype(x2d.dtype).itemsize
    sub = 16 if itemsize < 4 else 8                  # bf16 packs 16 rows/sublane group
    tm = _pick_tile(M, 512 if itemsize < 4 else 256, sub)

    # Keep all weights resident in VMEM (constant index_map -> no re-fetch per
    # M tile) whenever their double-buffered footprint is modest.
    weights_resident = 2 * n_out * N * K * itemsize <= 24 * 2**20

    if weights_resident:
        grid = (M // tm,)
        in_specs = ([pl.BlockSpec((tm, K), lambda i: (i, 0))]
                    + [pl.BlockSpec((N, K), lambda i: (0, 0))] * n_out)
        out_specs = tuple(pl.BlockSpec((tm, N), lambda i: (i, 0))
                          for _ in range(n_out))
        scratch = []
        kernel = functools.partial(_matmul_resident_kernel, n_out=n_out)
        dim_sem = ("parallel",)
        est = 2 * itemsize * (tm * K + n_out * (N * K + tm * N))
    else:
        # TODO(synk): for very large d_model on v7x (64 MiB VMEM), also tile N
        # here instead of keeping it untiled.
        tk = _pick_tile(K, 512, 128)
        grid = (M // tm, K // tk)
        in_specs = ([pl.BlockSpec((tm, tk), lambda i, kk: (i, kk))]
                    + [pl.BlockSpec((N, tk), lambda i, kk: (0, kk))] * n_out)
        out_specs = tuple(pl.BlockSpec((tm, N), lambda i, kk: (i, 0))
                          for _ in range(n_out))
        scratch = [pltpu.VMEM((tm, N), jnp.float32) for _ in range(n_out)]
        kernel = functools.partial(_matmul_ktiled_kernel, n_out=n_out)
        dim_sem = ("parallel", "arbitrary")
        est = (2 * itemsize * (tm * tk + n_out * (N * tk + tm * N))
               + 4 * n_out * tm * N)

    out_shape = tuple(jax.ShapeDtypeStruct((M, N), out_dtype) for _ in range(n_out))
    return pl.pallas_call(
        kernel,
        out_shape=out_shape,
        grid=grid,
        in_specs=in_specs,
        out_specs=out_specs,
        scratch_shapes=scratch,
        compiler_params=pltpu.CompilerParams(
            dimension_semantics=dim_sem,
            vmem_limit_bytes=_vmem_limit(est)),
    )(x2d, *weights)


# ----------------------------------------------------------------------------
# Flash-style multi-head attention (online softmax, mask=None), heads folded
# into the kernel: q/k/v blocks are full-d_model row slabs, per-head columns
# are sliced in VMEM, and the output is written as a lane-dense (tq, d_model)
# block — no XLA head split/merge transposes.
# ----------------------------------------------------------------------------
def _mha_flash_kernel(q_ref, k_ref, v_ref, o_ref, m_ref, l_ref, acc_ref, *,
                      num_heads, d_k, use_approx_recip):
    ki = pl.program_id(2)

    @pl.when(ki == 0)
    def _():
        m_ref[...] = jnp.full_like(m_ref, -jnp.inf)
        l_ref[...] = jnp.zeros_like(l_ref)
        acc_ref[...] = jnp.zeros_like(acc_ref)

    q = q_ref[0]                                     # (tq, d_model); scale folded into W_q
    k = k_ref[0]                                     # (tkv, d_model)
    v = v_ref[0]                                     # (tkv, d_model)

    nt_dims = (((1,), (1,)), ((), ()))               # q @ k^T without materializing k.T
    nn_dims = (((1,), (0,)), ((), ()))               # plain matmul

    for h in range(num_heads):                       # static unroll over heads
        cols = slice(h * d_k, (h + 1) * d_k)
        s = lax.dot_general(q[:, cols], k[:, cols], nt_dims,
                            preferred_element_type=jnp.float32)      # (tq, tkv) f32
        m_prev = m_ref[h]                                            # (tq, 1) f32
        m_new = jnp.maximum(m_prev, s.max(axis=-1, keepdims=True))
        alpha = jnp.exp(m_prev - m_new)
        p = jnp.exp(s - m_new)
        l_ref[h] = alpha * l_ref[h] + p.sum(axis=-1, keepdims=True)
        acc_ref[h] = alpha * acc_ref[h] + lax.dot_general(
            p.astype(v.dtype), v[:, cols], nn_dims,
            preferred_element_type=jnp.float32)                      # (tq, d_k)
        m_ref[h] = m_new

    @pl.when(ki == pl.num_programs(2) - 1)
    def _():
        outs = []
        for h in range(num_heads):
            if use_approx_recip:
                outs.append(acc_ref[h] * pl.reciprocal(l_ref[h], approx=True))
            else:
                outs.append(acc_ref[h] / l_ref[h])
        o_ref[0] = jnp.concatenate(outs, axis=-1).astype(o_ref.dtype)


def pallas_mha_attention(q, k, v, num_heads, *, use_approx_recip=False):
    """q: (B, Sq, d_model), k/v: (B, Skv, d_model) -> (B, Sq, d_model)."""
    B, Sq, d_model = q.shape
    Skv = k.shape[1]
    d_k = d_model // num_heads
    itemsize = jnp.dtype(q.dtype).itemsize
    sub = 16 if itemsize < 4 else 8
    # 256-wide tiles fill the 256x256 MXU on v6e/v7x and cut per-step overhead
    # and K/V re-streaming on v5e; tiny shapes fall back to the full dims.
    tq = _pick_tile(Sq, 256, sub)
    tkv = _pick_tile(Skv, 256, sub)
    grid = (B, Sq // tq, Skv // tkv)

    q_spec = pl.BlockSpec((1, tq, d_model), lambda b, qi, ki: (b, qi, 0))
    kv_spec = pl.BlockSpec((1, tkv, d_model), lambda b, qi, ki: (b, ki, 0))
    o_spec = pl.BlockSpec((1, tq, d_model), lambda b, qi, ki: (b, qi, 0))

    est = (2 * itemsize * (2 * tq * d_model + 2 * tkv * d_model)
           + 4 * (2 * num_heads * tq + tq * d_model))

    return pl.pallas_call(
        functools.partial(_mha_flash_kernel, num_heads=num_heads, d_k=d_k,
                          use_approx_recip=use_approx_recip),
        out_shape=jax.ShapeDtypeStruct((B, Sq, d_model), q.dtype),
        grid=grid,
        in_specs=[q_spec, kv_spec, kv_spec],
        out_specs=o_spec,
        scratch_shapes=[
            pltpu.VMEM((num_heads, tq, 1), jnp.float32),    # running max
            pltpu.VMEM((num_heads, tq, 1), jnp.float32),    # running denom
            pltpu.VMEM((num_heads, tq, d_k), jnp.float32),  # output accumulator
        ],
        compiler_params=pltpu.CompilerParams(
            dimension_semantics=("parallel", "parallel", "arbitrary"),
            vmem_limit_bytes=_vmem_limit(est)),
    )(q, k, v)


# ----------------------------------------------------------------------------
# MultiHeadAttention.forward (mask=None)
# ----------------------------------------------------------------------------
def multi_head_attention(params, query, key, value, num_heads, *,
                         compute_dtype=jnp.bfloat16, self_attention=False,
                         use_approx_recip=False):
    """query/key/value: (B, S, d_model) float32.
    params: W_q, W_k, W_v, W_o each (d_model, d_model) in nn.Linear layout.
    TODO(synk): mask != None path (masked_fill before softmax) not implemented."""
    B, Sq, d_model = query.shape
    assert d_model % num_heads == 0
    d_k = d_model // num_heads

    # Fold the 1/sqrt(d_k) softmax scale into W_q (free; done once per call).
    wq = (params["W_q"] * (1.0 / math.sqrt(d_k))).astype(compute_dtype)
    wk = params["W_k"].astype(compute_dtype)
    wv = params["W_v"].astype(compute_dtype)
    wo = params["W_o"].astype(compute_dtype)

    qx = query.reshape(B * Sq, d_model).astype(compute_dtype)

    if self_attention or (key is query and value is query):
        # Fused projection: x is read from HBM once for Q, K and V.
        Q2, K2, V2 = pallas_fused_linear(qx, (wq, wk, wv), out_dtype=compute_dtype)
        Skv = Sq
    else:
        Skv = key.shape[1]
        kx = key.reshape(B * Skv, d_model).astype(compute_dtype)
        vx = value.reshape(B * Skv, d_model).astype(compute_dtype)
        (Q2,) = pallas_fused_linear(qx, (wq,), out_dtype=compute_dtype)
        (K2,) = pallas_fused_linear(kx, (wk,), out_dtype=compute_dtype)
        (V2,) = pallas_fused_linear(vx, (wv,), out_dtype=compute_dtype)

    # No head split/merge transposes: the attention kernel consumes the
    # (B, S, d_model) projections directly and emits (B, Sq, d_model).
    attn = pallas_mha_attention(Q2.reshape(B, Sq, d_model),
                                K2.reshape(B, Skv, d_model),
                                V2.reshape(B, Skv, d_model),
                                num_heads, use_approx_recip=use_approx_recip)

    (out,) = pallas_fused_linear(attn.reshape(B * Sq, d_model), (wo,),
                                 out_dtype=jnp.float32)
    return out.reshape(B, Sq, d_model)


# ----------------------------------------------------------------------------
# Pure-JAX reference (full f32 matmul precision)
# ----------------------------------------------------------------------------
def reference_mha(params, query, key, value, num_heads):
    prec = jax.lax.Precision.HIGHEST
    B, Sq, d_model = query.shape
    Skv = key.shape[1]
    d_k = d_model // num_heads

    def proj(x, w, s):
        y = jnp.einsum("bsd,ed->bse", x, w, precision=prec)
        return y.reshape(B, s, num_heads, d_k).transpose(0, 2, 1, 3)

    Q = proj(query, params["W_q"], Sq)
    K = proj(key, params["W_k"], Skv)
    V = proj(value, params["W_v"], Skv)
    scores = jnp.einsum("bhqd,bhkd->bhqk", Q, K, precision=prec) / math.sqrt(d_k)
    attn = jax.nn.softmax(scores, axis=-1)
    out = jnp.einsum("bhqk,bhkd->bhqd", attn, V, precision=prec)
    out = out.transpose(0, 2, 1, 3).reshape(B, Sq, d_model)
    return jnp.einsum("bsd,ed->bse", out, params["W_o"], precision=prec)


# ----------------------------------------------------------------------------
# Main
# ----------------------------------------------------------------------------
if __name__ == "__main__":
    B, S, d_model, num_heads = 2, 8, 32, 4

    key0 = jax.random.PRNGKey(0)
    k_q, k_k, k_v, k_o, k_x = jax.random.split(key0, 5)
    init_scale = 1.0 / math.sqrt(d_model)
    params = {
        "W_q": jax.random.normal(k_q, (d_model, d_model), jnp.float32) * init_scale,
        "W_k": jax.random.normal(k_k, (d_model, d_model), jnp.float32) * init_scale,
        "W_v": jax.random.normal(k_v, (d_model, d_model), jnp.float32) * init_scale,
        "W_o": jax.random.normal(k_o, (d_model, d_model), jnp.float32) * init_scale,
    }
    x = jax.random.normal(k_x, (B, S, d_model), jnp.float32)

    ref = reference_mha(params, x, x, x, num_heads)

    # Default path: bf16 MXU operands, f32 accumulation and softmax statistics.
    out = multi_head_attention(params, x, x, x, num_heads, self_attention=True)
    out = jax.block_until_ready(out)
    assert out.shape == (B, S, d_model)
    assert out.dtype == jnp.float32
    assert jnp.allclose(out, ref, atol=1.5e-1, rtol=1e-1), (
        "bf16 mismatch vs reference (max abs err "
        f"{float(jnp.max(jnp.abs(out - ref))):.4f})")

    # f32 debug path (tolerance covers possible bf16 per-pass MXU operand rounding).
    out32 = multi_head_attention(params, x, x, x, num_heads,
                                 compute_dtype=jnp.float32, self_attention=True)
    out32 = jax.block_until_ready(out32)
    assert jnp.allclose(out32, ref, atol=5e-2, rtol=5e-2), (
        "f32 mismatch vs reference (max abs err "
        f"{float(jnp.max(jnp.abs(out32 - ref))):.4f})")

    print("KERNEL_OK")
</pallas_src>

<mosaic_0001>
module attributes {stable_mosaic.version = 11 : i64} {
  func.func @_matmul_resident_kernel(%arg0: i32, %arg1: memref<16x32xbf16, #tpu.memory_space<vmem>>, %arg2: memref<32x32xbf16, #tpu.memory_space<vmem>>, %arg3: memref<32x32xbf16, #tpu.memory_space<vmem>>, %arg4: memref<32x32xbf16, #tpu.memory_space<vmem>>, %arg5: memref<16x32xbf16, #tpu.memory_space<vmem>>, %arg6: memref<16x32xbf16, #tpu.memory_space<vmem>>, %arg7: memref<16x32xbf16, #tpu.memory_space<vmem>>) attributes {dimension_semantics = [#tpu.dimension_semantics<parallel>], iteration_bounds = array<i64: 1>, scalar_prefetch = 0 : i64, scratch_operands = 0 : i64, tpu.core_type = #tpu.core_type<tc>, window_params = [{transform_indices = @transform_0, window_bounds = array<i64: 16, 32>}, {pipeline_mode = #tpu.pipeline_mode<synchronous>, transform_indices = @transform_1, window_bounds = array<i64: 32, 32>}, {pipeline_mode = #tpu.pipeline_mode<synchronous>, transform_indices = @transform_2, window_bounds = array<i64: 32, 32>}, {pipeline_mode = #tpu.pipeline_mode<synchronous>, transform_indices = @transform_3, window_bounds = array<i64: 32, 32>}, {transform_indices = @transform_4, window_bounds = array<i64: 16, 32>}, {transform_indices = @transform_5, window_bounds = array<i64: 16, 32>}, {transform_indices = @transform_6, window_bounds = array<i64: 16, 32>}]} {
    %c0 = arith.constant 0 : index
    %c0_0 = arith.constant 0 : index
    %0 = vector.load %arg1[%c0, %c0_0] : memref<16x32xbf16, #tpu.memory_space<vmem>>, vector<16x32xbf16>
    %c0_1 = arith.constant 0 : index
    %c0_2 = arith.constant 0 : index
    %1 = vector.load %arg2[%c0_1, %c0_2] : memref<32x32xbf16, #tpu.memory_space<vmem>>, vector<32x32xbf16>
    %cst = arith.constant dense<0.000000e+00> : vector<16x32xf32>
    %2 = tpu.matmul %0, %1, %cst {dimension_numbers = #tpu.dot_dimension_numbers<[1], [1], [0], [0], [0, 0, 1, 0], [], []>} : vector<16x32xbf16>, vector<32x32xbf16>, vector<16x32xf32> -> vector<16x32xf32>
    %3 = arith.truncf %2 : vector<16x32xf32> to vector<16x32xbf16>
    %c0_3 = arith.constant 0 : index
    %c0_4 = arith.constant 0 : index
    %4 = vector.load %arg5[%c0_3, %c0_4] : memref<16x32xbf16, #tpu.memory_space<vmem>>, vector<16x32xbf16>
    tpu.vector_store %arg5[%c0_3, %c0_4], %3 {strides = array<i32>} : memref<16x32xbf16, #tpu.memory_space<vmem>>, vector<16x32xbf16>,
    %c0_5 = arith.constant 0 : index
    %c0_6 = arith.constant 0 : index
    %5 = vector.load %arg3[%c0_5, %c0_6] : memref<32x32xbf16, #tpu.memory_space<vmem>>, vector<32x32xbf16>
    %cst_7 = arith.constant dense<0.000000e+00> : vector<16x32xf32>
    %6 = tpu.matmul %0, %5, %cst_7 {dimension_numbers = #tpu.dot_dimension_numbers<[1], [1], [0], [0], [0, 0, 1, 0], [], []>} : vector<16x32xbf16>, vector<32x32xbf16>, vector<16x32xf32> -> vector<16x32xf32>
    %7 = arith.truncf %6 : vector<16x32xf32> to vector<16x32xbf16>
    %c0_8 = arith.constant 0 : index
    %c0_9 = arith.constant 0 : index
    %8 = vector.load %arg6[%c0_8, %c0_9] : memref<16x32xbf16, #tpu.memory_space<vmem>>, vector<16x32xbf16>
    tpu.vector_store %arg6[%c0_8, %c0_9], %7 {strides = array<i32>} : memref<16x32xbf16, #tpu.memory_space<vmem>>, vector<16x32xbf16>,
    %c0_10 = arith.constant 0 : index
    %c0_11 = arith.constant 0 : index
    %9 = vector.load %arg4[%c0_10, %c0_11] : memref<32x32xbf16, #tpu.memory_space<vmem>>, vector<32x32xbf16>
    %cst_12 = arith.constant dense<0.000000e+00> : vector<16x32xf32>
    %10 = tpu.matmul %0, %9, %cst_12 {dimension_numbers = #tpu.dot_dimension_numbers<[1], [1], [0], [0], [0, 0, 1, 0], [], []>} : vector<16x32xbf16>, vector<32x32xbf16>, vector<16x32xf32> -> vector<16x32xf32>
    %11 = arith.truncf %10 : vector<16x32xf32> to vector<16x32xbf16>
    %c0_13 = arith.constant 0 : index
    %c0_14 = arith.constant 0 : index
    %12 = vector.load %arg7[%c0_13, %c0_14] : memref<16x32xbf16, #tpu.memory_space<vmem>>, vector<16x32xbf16>
    tpu.vector_store %arg7[%c0_13, %c0_14], %11 {strides = array<i32>} : memref<16x32xbf16, #tpu.memory_space<vmem>>, vector<16x32xbf16>,
    return
  }
  func.func @transform_0(%arg0: i32) -> (i32, i32) {
    %c0_i32 = arith.constant 0 : i32
    %c0_i32_0 = arith.constant 0 : i32
    return %arg0, %c0_i32 : i32, i32
  }
  func.func @transform_1(%arg0: i32) -> (i32, i32) {
    %c0_i32 = arith.constant 0 : i32
    %c0_i32_0 = arith.constant 0 : i32
    %c0_i32_1 = arith.constant 0 : i32
    return %c0_i32, %c0_i32_0 : i32, i32
  }
  func.func @transform_2(%arg0: i32) -> (i32, i32) {
    %c0_i32 = arith.constant 0 : i32
    %c0_i32_0 = arith.constant 0 : i32
    %c0_i32_1 = arith.constant 0 : i32
    return %c0_i32, %c0_i32_0 : i32, i32
  }
  func.func @transform_3(%arg0: i32) -> (i32, i32) {
    %c0_i32 = arith.constant 0 : i32
    %c0_i32_0 = arith.constant 0 : i32
    %c0_i32_1 = arith.constant 0 : i32
    return %c0_i32, %c0_i32_0 : i32, i32
  }
  func.func @transform_4(%arg0: i32) -> (i32, i32) {
    %c0_i32 = arith.constant 0 : i32
    %c0_i32_0 = arith.constant 0 : i32
    return %arg0, %c0_i32 : i32, i32
  }
  func.func @transform_5(%arg0: i32) -> (i32, i32) {
    %c0_i32 = arith.constant 0 : i32
    %c0_i32_0 = arith.constant 0 : i32
    return %arg0, %c0_i32 : i32, i32
  }
  func.func @transform_6(%arg0: i32) -> (i32, i32) {
    %c0_i32 = arith.constant 0 : i32
    %c0_i32_0 = arith.constant 0 : i32
    return %arg0, %c0_i32 : i32, i32
  }
}

</mosaic_0001>

<bundles_post_ra>
// kernel: tpu_custom_call.1
= control target key start
LH: loop header
LB: loop body
LE: loop exit
PB: predicated region body
PF: predicated region fallthrough
CT: control target
= control target key end

     0   :  { %12 = vsyncpa [#allocation3], 0  ;;  %s780_s0 = inlined_call_operand.hbm [shape: bf16[16,32], index: 0, kind: input, shape index: {}]   ;;  %s781_s1 = inlined_call_operand.hbm [shape: bf16[32,32], index: 1, kind: input, shape index: {}]   ;;  %s782_s2 = inlined_call_operand.hbm [shape: bf16[32,32], index: 2, kind: input, shape index: {}]   ;;  %s783_s3 = inlined_call_operand.hbm [shape: bf16[32,32], index: 3, kind: input, shape index: {}]   ;;  %s784_s4 = inlined_call_operand.hbm [shape: bf16[16,32], index: 4, kind: output, shape index: {0}]   ;;  %s785_s5 = inlined_call_operand.hbm [shape: bf16[16,32], index: 5, kind: output, shape index: {1}]   ;;  %s786_s6 = inlined_call_operand.hbm [shape: bf16[16,32], index: 6, kind: output, shape index: {2}]  }
   0x1   :  { %13 = vsyncpa [#allocation6], 0 }
   0x2   :  { %14 = vsyncpa [#allocation9], 0 }
   0x3   :  { %15 = vsyncpa [#allocation4], 0 }
   0x4   :  { %16 = vsyncpa [#allocation12], 0  ;;  %s590_s21 = smov [#allocation5]   ;;  %s591_s23 = smov [#allocation2]  }
   0x5   :  { %s34_s22 = sshll.u32 %s590_s21, 4  ;;  %s22_s24 = sshll.u32 %s591_s23, 4  ;;  %s35_s22 = int_to_ptr.vmem [resolvable:$true] %s34_s22  ;;  %s636_s24 = int_to_ptr.vmem [resolvable:$true] %s22_s24 }
   0x6   :  { %s426_s27 = scalar_lea.hbm %s781_s1, 256 }
   0x7   :  { %p427_p0 = scmp.ne.s32.totalorder %s781_s1, %s426_s27  ;;  %p430_p1 = scmp.lt.u32.totalorder %s426_s27, %s781_s1 }
   0x9   :  { %p432_p2 = pnand %p430_p1, %p427_p0 }
   0xb   :  { %435 = shalt.err (!%p432_p2)
}
   0xc   :  { %s436_s8 = scalar_lea.vmem %s35_s22, 256  ;;  %p441_p4 = scmp.lt.s32.totalorder %s35_s22, %s35_s22 }
   0xd   :  { %p437_p3 = scmp.ne.s32.totalorder %s35_s22, %s436_s8  ;;  %p442_p5 = scmp.lt.s32.totalorder %s436_s8, %s436_s8 }
   0xf   :  { %p443_p6 = por %p442_p5, %p441_p4 }
  0x11   :  { %p444_p7 = pnand %p443_p6, %p437_p3 }
  0x13   :  { %447 = shalt.err (!%p444_p7)
}
  0x14   :  { %s592_s9 = smov 64   ;;  %s593_s10 = smov 4  }
  0x15   :  { %40 = dma.hbm_to_vmem [thread:$0]  %s781_s1, 256, %s35_s22, [#allocation6], %s592_s9, %s592_s9, %s593_s10  }
  0x16   :  { %s448_s15 = scalar_lea.hbm %s780_s0, 128 }
  0x17   :  { %p449_p8 = scmp.ne.s32.totalorder %s780_s0, %s448_s15  ;;  %p452_p9 = scmp.lt.u32.totalorder %s448_s15, %s780_s0 }
  0x19   :  { %p454_p10 = pnand %p452_p9, %p449_p8 }
  0x1b   :  { %457 = shalt.err (!%p454_p10)
}
  0x1c   :  { %s458_s20 = scalar_lea.vmem %s636_s24, 128  ;;  %p463_p12 = scmp.lt.s32.totalorder %s636_s24, %s636_s24 }
  0x1d   :  { %p459_p11 = scmp.ne.s32.totalorder %s636_s24, %s458_s20  ;;  %p464_p13 = scmp.lt.s32.totalorder %s458_s20, %s458_s20 }
  0x1f   :  { %p465_p0 = por %p464_p13, %p463_p12 }
  0x21   :  { %p466_p1 = pnand %p465_p0, %p459_p11 }
  0x23   :  { %469 = shalt.err (!%p466_p1)
}
  0x24   :  { %28 = dma.hbm_to_vmem [thread:$0]  %s780_s0, 128, %s636_s24, [#allocation3], %s592_s9, %s592_s9, %s593_s10  }
  0x25   :  { %s594_s22 = smov [#allocation7]   ;;  %s595_s25 = smov [#allocation8]  }
  0x26   :  { %s46_s23 = sshll.u32 %s594_s22, 4  ;;  %s58_s26 = sshll.u32 %s595_s25, 4  ;;  %s47_s23 = int_to_ptr.vmem [resolvable:$true] %s46_s23  ;;  %s673_s26 = int_to_ptr.vmem [resolvable:$true] %s58_s26 }
  0x27   :  { %s470_s29 = scalar_lea.hbm %s782_s2, 256 }
  0x28   :  { %p471_p2 = scmp.ne.s32.totalorder %s782_s2, %s470_s29  ;;  %p474_p3 = scmp.lt.u32.totalorder %s470_s29, %s782_s2 }
  0x2a   :  { %p476_p4 = pnand %p474_p3, %p471_p2 }
  0x2c   :  { %479 = shalt.err (!%p476_p4)
}
  0x2d   :  { %s480_s0 = scalar_lea.vmem %s47_s23, 256  ;;  %p485_p6 = scmp.lt.s32.totalorder %s47_s23, %s47_s23 }
  0x2e   :  { %p481_p5 = scmp.ne.s32.totalorder %s47_s23, %s480_s0  ;;  %p486_p7 = scmp.lt.s32.totalorder %s480_s0, %s480_s0 }
  0x30   :  { %p487_p8 = por %p486_p7, %p485_p6 }
  0x32   :  { %p488_p9 = pnand %p487_p8, %p481_p5 }
  0x34   :  { %491 = shalt.err (!%p488_p9)
}
  0x35   :  { %52 = dma.hbm_to_vmem [thread:$0]  %s782_s2, 256, %s47_s23, [#allocation6], %s592_s9, %s592_s9, %s593_s10  }
  0x36   :  { %s492_s15 = scalar_lea.hbm %s783_s3, 256 }
  0x37   :  { %p493_p10 = scmp.ne.s32.totalorder %s783_s3, %s492_s15  ;;  %p496_p11 = scmp.lt.u32.totalorder %s492_s15, %s783_s3 }
  0x39   :  { %p498_p12 = pnand %p496_p11, %p493_p10 }
  0x3b   :  { %501 = shalt.err (!%p498_p12)
}
  0x3c   :  { %s502_s20 = scalar_lea.vmem %s673_s26, 256  ;;  %p507_p0 = scmp.lt.s32.totalorder %s673_s26, %s673_s26 }
  0x3d   :  { %p503_p13 = scmp.ne.s32.totalorder %s673_s26, %s502_s20  ;;  %p508_p1 = scmp.lt.s32.totalorder %s502_s20, %s502_s20 }
  0x3f   :  { %p509_p2 = por %p508_p1, %p507_p0 }
  0x41   :  { %p510_p3 = pnand %p509_p2, %p503_p13 }
  0x43   :  { %513 = shalt.err (!%p510_p3)
}
  0x44   :  { %64 = dma.hbm_to_vmem [thread:$0]  %s783_s3, 256, %s673_s26, [#allocation9], %s592_s9, %s592_s9, %s593_s10  }
  0x45   :  { %580 = dma.done.wait [#allocation3], 128  }
  0x46   :  { %581 = vsyncadd [#allocation3], 4294967168 }
  0x47   :  { %582 = dma.done.wait [#allocation6], 512  }
  0x48   :  { %583 = vsyncadd [#allocation6], 4294966784 }
  0x49   :  { %584 = dma.done.wait [#allocation9], 256  }
  0x4a   :  { %585 = vsyncadd [#allocation9], 4294967040  ;;  %v596_v0 = vmov 0.0   ;;  %vm597_vm0 = vmmov 0   ;;  %vm99_vm1 = vcmask 261120   ;;  %v419_v1 = vld [vmem:[#allocation5] sm:$0xff]  }
  0x4b   :  { %384 = vmatprep.subr.bf16.mxu0 %v596_v0  ;;  %392 = vmatprep.subr.bf16.mxu1 %v596_v0  ;;  %v104_v2 = vsel %vm99_vm1, %v419_v1, 0  ;;  %v421_v3 = vld [vmem:[#allocation7] sm:$0xff]   ;;  %v420_v4 = vld [vmem:[#allocation5 + $0x8] sm:$0xff]   ;;  %v424_v6 = vld [vmem:[#allocation7 + $0x8] sm:$0xff]   ;;  %vm158_vm2 = vcmask 257024   ;;  %s598_s3 = smov [#allocation10]  }
  0x4c   :  { %388 = vmatprep.mubr.msk.bf16.mxu0 %vm597_vm0, %v596_v0  ;;  %396 = vmatprep.mubr.msk.bf16.mxu1 %vm597_vm0, %v596_v0  ;;  %v176_v5 = vsel %vm99_vm1, %v421_v3, 0  ;;  %v107_v7 = vsel %vm99_vm1, %v420_v4, 0  ;;  %v179_v8 = vsel %vm99_vm1, %v424_v6, 0  ;;  %v423_v9 = vld [vmem:[#allocation8] sm:$0xff]   ;;  %v422_v10 = vld [vmem:[#allocation2] sm:$0xff]   ;;  %v425_v12 = vld [vmem:[#allocation8 + $0x8] sm:$0xff]  }
  0x4d   :  { %385 = vmatpush3.bf16.xpose.msra.mxu0 %v104_v2  ;;  %393 = vmatpush3.bf16.xpose.msra.mxu1 %v176_v5  ;;  %v247_v11 = vsel %vm99_vm1, %v423_v9, 0  ;;  %v250_v13 = vsel %vm99_vm1, %v425_v12, 0  ;;  %s308_s21 = sshll.u32 %s598_s3, 4  ;;  %s599_s22 = smov [#allocation11]   ;;  %s309_s21 = int_to_ptr.vmem [resolvable:$true] %s308_s21 }
  0x4e   :  { %386 = vmatprep.subr.bf16.mxu0 %v596_v0  ;;  %394 = vmatprep.subr.bf16.mxu1 %v596_v0  ;;  %s320_s23 = sshll.u32 %s599_s22, 4  ;;  %s514_s25 = scalar_lea.vmem %s309_s21, 128  ;;  %s725_s23 = int_to_ptr.vmem [resolvable:$true] %s320_s23 }
  0x4f   :  { %p515_p4 = scmp.ne.s32.totalorder %s309_s21, %s514_s25  ;;  %p519_p5 = scmp.lt.s32.totalorder %s309_s21, %s309_s21 }
  0x50   :  { %p520_p6 = scmp.lt.s32.totalorder %s514_s25, %s514_s25 }
  0x52   :  { %p521_p7 = por %p520_p6, %p519_p5 }
  0x54   :  { %p522_p8 = pnand %p521_p7, %p515_p4 }
  0x55   :  { %387 = vmatpush3.bf16.xpose.msra.mxu0 %v107_v7  ;;  %395 = vmatpush3.bf16.xpose.msra.mxu1 %v179_v8 }
  0x56   :  { %400 = vmatprep.subr.bf16.mxu0 %v596_v0 }
  0x5c   :  { %389 = vmatmul.mubr.msk.bf16.vlgmr.msra.gmra.mrb[0].mxu0 %vm99_vm1, %v422_v10  ;;  %397 = vmatmul.mubr.msk.bf16.vlgmr.msra.gmra.mrb[0].mxu1 %vm99_vm1, %v422_v10 }
  0x5d   :  { %401 = vmatpush3.bf16.xpose.msra.mxu0 %v247_v11  ;;  %404 = vmatprep.mubr.msk.bf16.mxu0 %vm597_vm0, %v596_v0 }
  0x5e   :  { %402 = vmatprep.subr.bf16.mxu0 %v596_v0 }
  0x65   :  { %403 = vmatpush3.bf16.xpose.msra.mxu0 %v250_v13 }
  0x6c   :  { %405 = vmatmul.mubr.msk.bf16.vlgmr.msra.gmra.mrb[4].mxu0 %vm99_vm1, %v422_v10 }
 0x12f   :  { %v143_v14 = vpop.f32.mrb[0].mxu0  ;;  %v215_v18 = vpop.f32.mrb[0].mxu1 }
 0x130   :  { %v369_v15 = vpack.c.bf16 %v143_v14, %v143_v14  ;;  %v390_v16 = vpop.f32.mrb[1].mxu0  ;;  %v371_v21 = vpack.c.bf16 %v215_v18, %v215_v18  ;;  %v398_v22 = vpop.f32.mrb[1].mxu1 }
 0x131   :  { %v146_v17 = vpop.f32.mrb[2].mxu0  ;;  %v218_v23 = vpop.f32.mrb[2].mxu1 }
 0x132   :  { %v370_v19 = vpack.c.bf16 %v146_v17, %v146_v17  ;;  %v391_v20 = vpop.f32.mrb[3].mxu0  ;;  %159 = vst.msk [vmem:[#allocation10] sm:$0xf] %vm158_vm2, %v369_v15  ;;  %v372_v24 = vpack.c.bf16 %v218_v23, %v218_v23  ;;  %v399_v25 = vpop.f32.mrb[3].mxu1  ;;  %230 = vst.msk [vmem:[#allocation11] sm:$0xf] %vm158_vm2, %v371_v21 }
 0x134   :  { %160 = vst.msk [vmem:[#allocation10 + $0x4] sm:$0xf] %vm158_vm2, %v370_v19 }
 0x135   :  { %525 = shalt.err (!%p522_p8)
}
 0x136   :  { %s526_s28 = scalar_lea.hbm %s784_s4, 128 }
 0x137   :  { %p527_p9 = scmp.ne.s32.totalorder %s784_s4, %s526_s28  ;;  %p530_p10 = scmp.lt.u32.totalorder %s526_s28, %s784_s4 }
 0x139   :  { %p532_p11 = pnand %p530_p10, %p527_p9 }
 0x13b   :  { %535 = shalt.err (!%p532_p11)
}
 0x13c   :  { %314 = dma.vmem_to_hbm [thread:$0]  %s309_s21, 128, %s784_s4, [#allocation4], %s592_s9, %s592_s9, %s593_s10   ;;  %231 = vst.msk [vmem:[#allocation11 + $0x4] sm:$0xf] %vm158_vm2, %v372_v24 }
 0x13d   :  { %s536_s24 = scalar_lea.vmem %s725_s23, 128  ;;  %p541_p13 = scmp.lt.s32.totalorder %s725_s23, %s725_s23 }
 0x13e   :  { %p537_p12 = scmp.ne.s32.totalorder %s725_s23, %s536_s24  ;;  %p542_p0 = scmp.lt.s32.totalorder %s536_s24, %s536_s24 }
 0x140   :  { %p543_p1 = por %p542_p0, %p541_p13 }
 0x142   :  { %p544_p2 = pnand %p543_p1, %p537_p12 }
 0x144   :  { %547 = shalt.err (!%p544_p2)
}
 0x145   :  { %s548_s14 = scalar_lea.hbm %s785_s5, 128 }
 0x146   :  { %p549_p3 = scmp.ne.s32.totalorder %s785_s5, %s548_s14  ;;  %p552_p4 = scmp.lt.u32.totalorder %s548_s14, %s785_s5 }
 0x148   :  { %p554_p5 = pnand %p552_p4, %p549_p3 }
 0x14a   :  { %557 = shalt.err (!%p554_p5)
}
 0x14b   :  { %326 = dma.vmem_to_hbm [thread:$0]  %s725_s23, 128, %s785_s5, [#allocation12], %s592_s9, %s592_s9, %s593_s10   ;;  %v286_v26 = vpop.f32.mrb[4].mxu0 }
 0x14c   :  { %s600_s20 = smov [#allocation13]   ;;  %v373_v27 = vpack.c.bf16 %v286_v26, %v286_v26  ;;  %v406_v28 = vpop.f32.mrb[5].mxu0 }
 0x14d   :  { %s332_s2 = sshll.u32 %s600_s20, 4  ;;  %v289_v29 = vpop.f32.mrb[6].mxu0  ;;  %s333_s2 = int_to_ptr.vmem [resolvable:$true] %s332_s2 }
 0x14e   :  { %301 = vst.msk [vmem:[#allocation13] sm:$0xf] %vm158_vm2, %v373_v27  ;;  %v374_v30 = vpack.c.bf16 %v289_v29, %v289_v29  ;;  %v407_v31 = vpop.f32.mrb[7].mxu0  ;;  %s558_s1 = scalar_lea.vmem %s333_s2, 128  ;;  %p563_p7 = scmp.lt.s32.totalorder %s333_s2, %s333_s2 }
 0x14f   :  { %p559_p6 = scmp.ne.s32.totalorder %s333_s2, %s558_s1  ;;  %p564_p8 = scmp.lt.s32.totalorder %s558_s1, %s558_s1 }
 0x150   :  { %302 = vst.msk [vmem:[#allocation13 + $0x4] sm:$0xf] %vm158_vm2, %v374_v30 }
 0x151   :  { %p565_p9 = por %p564_p8, %p563_p7 }
 0x153   :  { %p566_p10 = pnand %p565_p9, %p559_p6 }
 0x155   :  { %569 = shalt.err (!%p566_p10)
}
 0x156   :  { %s570_s21 = scalar_lea.hbm %s786_s6, 128 }
 0x157   :  { %p571_p11 = scmp.ne.s32.totalorder %s786_s6, %s570_s21  ;;  %p574_p12 = scmp.lt.u32.totalorder %s570_s21, %s786_s6 }
 0x159   :  { %p576_p13 = pnand %p574_p12, %p571_p11 }
 0x15b   :  { %579 = shalt.err (!%p576_p13)
}
 0x15c   :  { %338 = dma.vmem_to_hbm [thread:$0]  %s333_s2, 128, %s786_s6, [#allocation12], %s592_s9, %s592_s9, %s593_s10  }
 0x15d   :  { %586 = dma.done.wait [#allocation4], 128  }
 0x15e   :  { %587 = vsyncadd [#allocation4], 4294967168 }
 0x15f   :  { %588 = dma.done.wait [#allocation12], 256  }
 0x160   :  { %589 = vsyncadd [#allocation12], 4294967040 }
 0x161   :  { %348 = vsyncpa [#allocation3], 1 }
 0x162   :  { %349 = vsyncpa [#allocation6], 1 }
 0x163   :  { %350 = vsyncpa [#allocation9], 1 }
 0x164   :  { %351 = vsyncpa [#allocation4], 1 }
 0x165   :  { %352 = vsyncpa [#allocation12], 1 }

</bundles_post_ra>
